<compile_context>
chip_gen: v7x
topology: tpu7x:2x2x1
jax: 0.10.0
libtpu: 0.0.40
codegen_flags: <defaults>
</compile_context>

<pallas_src>
import jax
import jax.numpy as jnp
import numpy as np
from jax.experimental import pallas as pl
from jax.experimental.pallas import tpu as pltpu


def _vmem_capacity_bytes():
    try:
        return int(pltpu.get_tpu_info().vmem_capacity_bytes)
    except Exception:
        return 64 << 20  # conservative fallback (v7x per-core VMEM)


def _round_up(x, m):
    return (x + m - 1) // m * m


def _pick_t_tile(T, row_bytes, budget_bytes):
    """Largest tile that divides T, is a multiple of 8 (or == T), and fits budget."""
    cands = sorted({T} | {t for t in range(8, T, 8) if T % t == 0})
    best = cands[0]
    for t in cands:
        if t * row_bytes <= budget_bytes:
            best = t
    return best


def _gcn_fused_kernel(x_ref, m_ref, b_ref, o_ref):
    # x_ref: (1, tT, V*Cin)       bf16  channels-last, (v, c) flattened per frame
    # m_ref: (V*Cin, VCout_pad)   bf16  fused conv + graph-agg + BN-scale operator
    # b_ref: (1, VCout_pad)       f32   fused conv-bias + graph-agg + BN shift
    # o_ref: (1, tT, VCout_pad)   f32
    x = x_ref[0]                                                    # (tT, V*Cin)
    y = jnp.dot(x, m_ref[...], preferred_element_type=jnp.float32)  # one MXU matmul
    y = y + b_ref[...]                                              # broadcast over tT
    o_ref[0] = jnp.maximum(y, 0.0).astype(o_ref.dtype)              # ReLU epilogue


def unit_gcn_forward_channels_last(x_ntvc, conv_w, conv_b, A, PA,
                                   gamma, beta, run_mean, run_var, eps=1e-5):
    """Channels-last fast path: x (N, T, V, Cin) -> (N, T, V, Cout)."""
    N, T, V, Cin = x_ntvc.shape
    K = A.shape[0]
    Cout = conv_w.shape[0] // K

    # ---- fold conv weight, A*PA ('importance'), conv bias and eval-mode BN
    #      into one operator + one additive vector (computed once, off hot path)
    A_eff = (A * PA).astype(jnp.float32)                           # (K, V, V)
    W_kdc = conv_w.reshape(K, Cout, Cin).astype(jnp.float32)       # (K, Cout, Cin)
    scale = (gamma / jnp.sqrt(run_var + eps)).astype(jnp.float32)  # (Cout,)
    shift = (beta - run_mean * scale).astype(jnp.float32)          # (Cout,)

    M = jnp.einsum('kvw,kdc->vcwd', A_eff, W_kdc * scale[None, :, None])
    M = M.reshape(V * Cin, V * Cout)
    colsum = A_eff.sum(axis=1)                                     # (K, W) = sum_v A_eff
    b_kd = conv_b.reshape(K, Cout).astype(jnp.float32)
    bias = jnp.einsum('kw,kd->wd', colsum, b_kd * scale[None, :]) + shift[None, :]
    bias = bias.reshape(V * Cout)

    # ---- lane-dense padding of the fused output-channel axis (multiple of 128)
    VCin = V * Cin
    VCout = V * Cout
    VCp = _round_up(VCout, 128)
    if VCp != VCout:
        M = jnp.pad(M, ((0, 0), (0, VCp - VCout)))
        bias = jnp.pad(bias, (0, VCp - VCout))

    # bf16 activations / operator, f32 accumulation inside the kernel
    x_flat = x_ntvc.reshape(N, T, VCin).astype(jnp.bfloat16)
    M = M.astype(jnp.bfloat16)
    bias = bias.reshape(1, VCp).astype(jnp.float32)

    # ---- T tiling: per-step VMEM budget derived from the device VMEM capacity
    vmem_cap = _vmem_capacity_bytes()
    row_bytes = 2 * (VCin * 2) + 2 * (VCp * 4)      # double-buffered in(bf16)+out(f32)
    fixed_bytes = M.size * 2 + VCp * 4              # resident operator + bias
    tT = _pick_t_tile(T, row_bytes, max(vmem_cap // 4 - fixed_bytes, 1 << 20))
    grid = (N, T // tT)

    vmem_limit = int(min(vmem_cap * 3 // 4,
                         max(32 << 20, tT * row_bytes + fixed_bytes + (4 << 20))))

    out_flat = pl.pallas_call(
        _gcn_fused_kernel,
        out_shape=jax.ShapeDtypeStruct((N, T, VCp), jnp.float32),
        grid=grid,
        in_specs=[
            pl.BlockSpec((1, tT, VCin), lambda n, t: (n, t, 0)),
            pl.BlockSpec((VCin, VCp), lambda n, t: (0, 0)),   # operator stays resident
            pl.BlockSpec((1, VCp), lambda n, t: (0, 0)),
        ],
        out_specs=pl.BlockSpec((1, tT, VCp), lambda n, t: (n, t, 0)),
        compiler_params=pltpu.CompilerParams(
            dimension_semantics=("parallel", "parallel"),
            vmem_limit_bytes=vmem_limit),
    )(x_flat, M, bias)

    return out_flat[..., :VCout].reshape(N, T, V, Cout)


def unit_gcn_forward(x_nctv, conv_w, conv_b, A, PA, gamma, beta,
                     run_mean, run_var, eps=1e-5):
    """PyTorch-layout entry point: x (N, Cin, T, V) -> (N, Cout, T, V)."""
    # TODO(synk): keep the whole model channels-last (call
    # unit_gcn_forward_channels_last directly) to drop these two activation
    # transposes — each is a full extra HBM round trip for a mem-bound layer.
    x_ntvc = jnp.transpose(x_nctv, (0, 2, 3, 1))
    out_ntvc = unit_gcn_forward_channels_last(
        x_ntvc, conv_w, conv_b, A, PA, gamma, beta, run_mean, run_var, eps)
    return jnp.transpose(out_ntvc, (0, 3, 1, 2))


def reference_forward(x, conv_w, conv_b, A, PA, gamma, beta, rm, rv, eps=1e-5):
    """Pure-JAX f32 reference mirroring the PyTorch forward (eval-mode BN)."""
    N, Cin, T, V = x.shape
    K = A.shape[0]
    Cout = conv_w.shape[0] // K
    y = jnp.einsum('nctv,oc->notv', x, conv_w) + conv_b[None, :, None, None]
    y = y.reshape(N, K, Cout, T, V)
    A_eff = A * PA
    z = jnp.einsum('nkctv,kvw->nctw', y, A_eff)
    bn = ((z - rm[None, :, None, None]) / jnp.sqrt(rv + eps)[None, :, None, None]
          * gamma[None, :, None, None] + beta[None, :, None, None])
    return jnp.maximum(bn, 0.0)


if __name__ == "__main__":
    # Small shapes: N=2, Cin=4, T=8, V=16 graph nodes, K=3 subsets, Cout=8
    N, Cin, T, V = 2, 4, 8, 16
    K, Cout = 3, 8

    key = jax.random.PRNGKey(0)
    kx, kA, kw, kb = jax.random.split(key, 4)

    x = jax.random.normal(kx, (N, Cin, T, V), jnp.float32)
    A = jax.random.uniform(kA, (K, V, V), jnp.float32)            # adjacency buffer
    PA = jnp.ones((K, V, V), jnp.float32)                         # 'importance' init: 1
    conv_w = jax.random.normal(kw, (K * Cout, Cin), jnp.float32) * 0.1   # 1x1 conv weight
    conv_b = jax.random.normal(kb, (K * Cout,), jnp.float32) * 0.1       # 1x1 conv bias

    # BatchNorm2d(out_channels) init: gamma=1, beta=0, running_mean=0, running_var=1
    gamma = jnp.ones((Cout,), jnp.float32)
    beta = jnp.zeros((Cout,), jnp.float32)
    run_mean = jnp.zeros((Cout,), jnp.float32)
    run_var = jnp.ones((Cout,), jnp.float32)

    out = unit_gcn_forward(x, conv_w, conv_b, A, PA, gamma, beta, run_mean, run_var)
    out = jax.block_until_ready(out)

    ref = reference_forward(x, conv_w, conv_b, A, PA, gamma, beta, run_mean, run_var)
    # bf16 inputs with f32 accumulation -> loosened tolerance vs the f32 reference
    np.testing.assert_allclose(np.asarray(out), np.asarray(ref), rtol=2e-2, atol=2e-2)

    assert out.shape == (N, Cout, T, V)
    print("KERNEL_OK")
</pallas_src>

<mosaic_0001>
module attributes {stable_mosaic.version = 11 : i64} {
  func.func @_gcn_fused_kernel(%arg0: i32, %arg1: i32, %arg2: memref<1x8x64xbf16, #tpu.memory_space<vmem>>, %arg3: memref<64x128xbf16, #tpu.memory_space<vmem>>, %arg4: memref<1x128xf32, #tpu.memory_space<vmem>>, %arg5: memref<1x8x128xf32, #tpu.memory_space<vmem>>) attributes {dimension_semantics = [#tpu.dimension_semantics<parallel>, #tpu.dimension_semantics<parallel>], iteration_bounds = array<i64: 2, 1>, scalar_prefetch = 0 : i64, scratch_operands = 0 : i64, tpu.core_type = #tpu.core_type<tc>, window_params = [{transform_indices = @transform_0, window_bounds = array<i64: 1, 8, 64>}, {pipeline_mode = #tpu.pipeline_mode<synchronous>, transform_indices = @transform_1, window_bounds = array<i64: 64, 128>}, {pipeline_mode = #tpu.pipeline_mode<synchronous>, transform_indices = @transform_2, window_bounds = array<i64: 1, 128>}, {transform_indices = @transform_3, window_bounds = array<i64: 1, 8, 128>}]} {
    %c0 = arith.constant 0 : index
    %c0_0 = arith.constant 0 : index
    %c0_1 = arith.constant 0 : index
    %0 = vector.load %arg2[%c0, %c0_0, %c0_1] : memref<1x8x64xbf16, #tpu.memory_space<vmem>>, vector<1x8x64xbf16>
    %1 = vector.shape_cast %0 : vector<1x8x64xbf16> to vector<8x64xbf16>
    %c0_2 = arith.constant 0 : index
    %c0_3 = arith.constant 0 : index
    %2 = vector.load %arg3[%c0_2, %c0_3] : memref<64x128xbf16, #tpu.memory_space<vmem>>, vector<64x128xbf16>
    %cst = arith.constant dense<0.000000e+00> : vector<8x128xf32>
    %3 = tpu.matmul %1, %2, %cst {dimension_numbers = #tpu.dot_dimension_numbers<[1], [0], [0], [1], [0, 0, 1, 1], [], []>} : vector<8x64xbf16>, vector<64x128xbf16>, vector<8x128xf32> -> vector<8x128xf32>
    %c0_4 = arith.constant 0 : index
    %c0_5 = arith.constant 0 : index
    %4 = vector.load %arg4[%c0_4, %c0_5] : memref<1x128xf32, #tpu.memory_space<vmem>>, vector<1x128xf32>
    %5 = vector.broadcast %4 : vector<1x128xf32> to vector<8x128xf32>
    %6 = arith.addf %3, %5 : vector<8x128xf32>
    %cst_6 = arith.constant 0.000000e+00 : f32
    %7 = vector.broadcast %cst_6 : f32 to vector<8x128xf32>
    %8 = arith.maximumf %6, %7 : vector<8x128xf32>
    %c0_7 = arith.constant 0 : index
    %c0_8 = arith.constant 0 : index
    %c0_9 = arith.constant 0 : index
    %9 = vector.load %arg5[%c0_7, %c0_8, %c0_9] : memref<1x8x128xf32, #tpu.memory_space<vmem>>, vector<1x8x128xf32>
    %10 = vector.shape_cast %9 : vector<1x8x128xf32> to vector<8x128xf32>
    %11 = vector.shape_cast %8 : vector<8x128xf32> to vector<1x8x128xf32>
    tpu.vector_store %arg5[%c0_7, %c0_8, %c0_9], %11 {strides = array<i32>} : memref<1x8x128xf32, #tpu.memory_space<vmem>>, vector<1x8x128xf32>,
    return
  }
  func.func @transform_0(%arg0: i32, %arg1: i32) -> (i32, i32, i32) {
    %c0_i32 = arith.constant 0 : i32
    %c0_i32_0 = arith.constant 0 : i32
    return %arg0, %arg1, %c0_i32 : i32, i32, i32
  }
  func.func @transform_1(%arg0: i32, %arg1: i32) -> (i32, i32) {
    %c0_i32 = arith.constant 0 : i32
    %c0_i32_0 = arith.constant 0 : i32
    %c0_i32_1 = arith.constant 0 : i32
    return %c0_i32, %c0_i32_0 : i32, i32
  }
  func.func @transform_2(%arg0: i32, %arg1: i32) -> (i32, i32) {
    %c0_i32 = arith.constant 0 : i32
    %c0_i32_0 = arith.constant 0 : i32
    %c0_i32_1 = arith.constant 0 : i32
    return %c0_i32, %c0_i32_0 : i32, i32
  }
  func.func @transform_3(%arg0: i32, %arg1: i32) -> (i32, i32, i32) {
    %c0_i32 = arith.constant 0 : i32
    %c0_i32_0 = arith.constant 0 : i32
    return %arg0, %arg1, %c0_i32 : i32, i32, i32
  }
}

</mosaic_0001>

<bundles_post_ra>
// kernel: tpu_custom_call.1
= control target key start
LH: loop header
LB: loop body
LE: loop exit
PB: predicated region body
PF: predicated region fallthrough
CT: control target
= control target key end

     0   :  { %8 = vsyncpa [#allocation3], 0  ;;  %s920_s0 = inlined_call_operand.hbm [shape: bf16[2,8,64], index: 0, kind: input, shape index: {}]   ;;  %s921_s1 = inlined_call_operand.hbm [shape: bf16[64,128], index: 1, kind: input, shape index: {}]   ;;  %s922_s2 = inlined_call_operand.vmem [shape: f32[1,128], index: 2, kind: input, shape index: {}]   ;;  %s923_s3 = inlined_call_operand.hbm [shape: f32[2,8,128], index: 3, kind: output, shape index: {}]  }
   0x1   :  { %10 = vsyncpa [#allocation3 + $0x1], 0 }
   0x2   :  { %11 = vsyncpa [#allocation6], 0 }
   0x3   :  { %12 = vsyncpa [#allocation4], 0 }
   0x4   :  { %14 = vsyncpa [#allocation4 + $0x1], 0  ;;  %s702_s12 = smov 0   ;;  %s704_s13 = smov 0  }
   0x5   :  { %s706_s14 = smov 0   ;;  %s708_s15 = smov 0  }
   0x6   :  { %s710_s16 = smov 0   ;;  %s712_s17 = smov 0  }
   0x7 LB: > { %s410_s18 = sadd.s32 4294967295, %s673_s17   ;;  %s411_s19 = sadd.s32 4294967294, %s673_s17   ;;  %s673_s17 = sphi %s712_s17, %s20_s17   ;;  %s669_s16 = sphi %s710_s16, %s947_s16   ;;  %s665_s15 = sphi %s708_s15, %s946_s15   ;;  %s661_s14 = sphi %s706_s14, %s945_s14   ;;  %s657_s13 = sphi %s704_s13, %s944_s13   ;;  %s653_s12 = sphi %s702_s12, %s943_s12  }
   0x8   : > { %p54_p0 = scmp.ne.s32.totalorder %s657_s13, %s653_s12  ;;  %p736_p1 = scmp.eq.s32.totalorder %s410_s18, 0 }
   0x9   : > { %p740_p2 = scmp.eq.s32.totalorder %s410_s18, 1  ;;  %p128_p3 = scmp.eq.s32.totalorder %s411_s19, 1 }
   0xa   : > { %s928_s20 = scalar_select %p736_p1, 1, 0 }
   0xb   : > { %s929_s21 = scalar_select %p740_p2, 1, 0 }
   0xc   : > { %p746_p4 = por %p736_p1, %p54_p0  ;;  %p412_p5 = scmp.ge.s32.totalorder %s673_s17, 1 }
   0xd   : > { %p751_p6 = por %p128_p3, %p54_p0  ;;  %p135_p7 = scmp.lt.s32.totalorder %s673_s17, 3 }
   0xe   : > { %s930_s22 = scalar_select %p746_p4, 1, 0 }
   0xf   : > { %s931_s23 = scalar_select %p751_p6, 1, 0 }
  0x10   : > { %p756_p8 = pnand %p412_p5, %p135_p7  ;;  %s675_s25 = smov [#allocation5]  }
  0x11   : > { %s147_s26 = sshll.u32 %s675_s25, 4  ;;  %s32_s28 = sadd.s32 1, %s669_s16  ;;  %s148_s26 = int_to_ptr.vmem [resolvable:$true] %s147_s26 }
  0x12   : > { %s932_s24 = scalar_select %p756_p8, 1, 0 }
  0x13   : > { %p456_p9 = pneg %p756_p8  ;;  %s529_s4 = scalar_lea.hbm %s921_s1, 512 }
  0x14   : > { %p530_p12 = scmp.ne.s32.totalorder %s921_s1, %s529_s4  ;;  %p536_p5 = scmp.lt.u32.totalorder %s529_s4, %s921_s1 }
  0x15   : > { %p765_p11 = pnand %p456_p9, %p736_p1 }
  0x17   : > { %p531_p13 = pneg %p765_p11 }
  0x19   : > { %p532_p0 = pnand %p531_p13, %p530_p12 }
  0x1b   : > { %p533_p3 = pneg %p532_p0 }
  0x1d   : > { %p538_p7 = pnand %p536_p5, %p533_p3 }
  0x1f   : > { %541 = shalt.err (!%p538_p7)
}
  0x20   : > { %s542_s9 = scalar_lea.vmem %s148_s26, 512  ;;  %p550_p1 = scmp.lt.s32.totalorder %s148_s26, %s148_s26 }
  0x21   : > { %p543_p9 = scmp.ne.s32.totalorder %s148_s26, %s542_s9  ;;  %p551_p4 = scmp.lt.s32.totalorder %s542_s9, %s542_s9 }
  0x23   : > { %p545_p10 = pnand %p543_p9, %p531_p13  ;;  %p552_p8 = por %p551_p4, %p550_p1 }
  0x25   : > { %p546_p6 = pneg %p545_p10 }
  0x27   : > { %p553_p2 = pnand %p552_p8, %p546_p6 }
  0x29   : > { %556 = shalt.err (!%p553_p2)
}
  0x2a   : > { %s676_s10 = smov 64   ;;  %s677_s11 = smov 4  }
  0x2b   : > { %459 = dma.hbm_to_vmem [thread:$0]  (!%p765_p11), %s921_s1, 512, %s148_s26, [#allocation6], %s676_s10, %s676_s10, %s677_s11  }
  0x2c   : > { %p34_p1 = scmp.ge.s32.totalorder %s32_s28, 2  ;;  %s41_s25 = sadd.s32 1, %s661_s14 }
  0x2d   : > { %p48_p2 = scmp.ne.s32.totalorder %s661_s14, %s657_s13  ;;  %p49_p4 = scmp.eq.s32.totalorder %s673_s17, 0 }
  0x2e   : > { %s949_s28 = smov (%p34_p1, %s32_s28), 0  ;;  %p935_p8 = scmp.ne.s32.totalorder %s929_s21, 0 }
  0x2f   : > { %p792_p6 = por %p49_p4, %p48_p2  ;;  %s36_s27 = ssub.s32 %s669_s16, %s949_s28 }
  0x30   : > { %p798_p10 = por %p935_p8, %p48_p2  ;;  %p469_p12 = scmp.lt.s32.totalorder %s673_s17, 2 }
  0x31   : > { %p39_p11 = scmp.eq.s32.totalorder %s36_s27, 0  ;;  %s164_s26 = sand.u32 1, %s661_s14  }
  0x32   : > { %s415_s4 = sshll.u32 %s164_s26, 2  ;;  %s416_s6 = sshll.u32 %s669_s16, 6 }
  0x33   : > { %s807_s5 = scalar_select %p39_p11, %s661_s14, %s41_s25  }
  0x34   : > { %s813_s9 = scalar_lea.hbm %s920_s0, %s416_s6  ;;  %s168_s21 = scalar_lea.vmem [#allocation2], %s415_s4 }
  0x35   : > { %s176_s10 = sshll.u32 %s168_s21, 4  ;;  %p819_p13 = pnand %p469_p12, %p792_p6  ;;  %s815_s10 = int_to_ptr.vmem [resolvable:$true] %s176_s10 }
  0x36   : > { %s165_s18 = scalar_lea.sflag [#allocation3], %s164_s26  ;;  %s557_s19 = scalar_lea.hbm %s813_s9, 64 }
  0x37   : > { %p558_p0 = scmp.ne.s32.totalorder %s813_s9, %s557_s19  ;;  %p559_p3 = pneg %p819_p13 }
  0x38   : > { %s562_s4 = scalar_lea.hbm %s920_s0, 128  ;;  %p563_p9 = scmp.lt.u32.totalorder %s813_s9, %s920_s0 }
  0x39   : > { %p560_p5 = pnand %p559_p3, %p558_p0  ;;  %p564_p1 = scmp.lt.u32.totalorder %s562_s4, %s557_s19 }
  0x3a   : > { %p566_p4 = scmp.lt.u32.totalorder %s557_s19, %s813_s9 }
  0x3b   : > { %p561_p7 = pneg %p560_p5  ;;  %p565_p2 = por %p564_p1, %p563_p9 }
  0x3d   : > { %p567_p6 = por %p566_p4, %p565_p2 }
  0x3f   : > { %p568_p8 = pnand %p567_p6, %p561_p7 }
  0x41   : > { %571 = shalt.err (!%p568_p8)
}
  0x42   : > { %s572_s26 = scalar_lea.vmem %s815_s10, 64  ;;  %s678_s7 = smov [#allocation2]  }
  0x43   : > { %p573_p12 = scmp.ne.s32.totalorder %s815_s10, %s572_s26  ;;  %s577_s8 = sshll.u32 %s678_s7, 4  ;;  %s578_s8 = int_to_ptr.vmem [resolvable:$false] %s577_s8 }
  0x44   : > { %s579_s21 = scalar_lea.vmem %s578_s8, 128  ;;  %p580_p5 = scmp.lt.s32.totalorder %s815_s10, %s578_s8 }
  0x45   : > { %p575_p11 = pnand %p573_p12, %p559_p3  ;;  %p581_p9 = scmp.lt.s32.totalorder %s579_s21, %s572_s26 }
  0x47   : > { %p576_p0 = pneg %p575_p11  ;;  %p582_p1 = por %p581_p9, %p580_p5 }
  0x49   : > { %p583_p2 = pnand %p582_p1, %p576_p0 }
  0x4b   : > { %586 = shalt.err (!%p583_p2)
}
  0x4c   : > { %463 = dma.hbm_to_vmem [thread:$0]  (!%p819_p13), %s813_s9, 64, %s815_s10, %s165_s18  }
  0x4d   : > { %p938_p7 = scmp.ne.s32.totalorder %s932_s24, 0 }
  0x4e   : > { %s851_s19 = sand.u32 (!%p938_p7), 1, %s657_s13   ;;  %p939_p3 = scmp.ne.s32.totalorder (!%p938_p7), %s930_s22, 0 }
  0x4f   : > { %185 = sbr.rel (%p938_p7) target bundleno = 337 (0x151), region = 32  ;;  %s418_s25 = sshll.u32 (!%p938_p7), %s851_s19, 2 }
  0x50   : > { %s188_s27 = scalar_lea.sflag (!%p938_p7), [#allocation3], %s851_s19  ;;  %s191_s4 = scalar_lea.vmem (!%p938_p7), [#allocation2], %s418_s25 }
  0x56   : > { %640 = dma.done.wait (%p939_p3), %s188_s27, 64  }
  0x57   : > { %642 = vsyncadd (%p939_p3), %s188_s27, 4294967232  ;;  %p940_p4 = scmp.ne.s32.totalorder %s928_s20, 0 }
  0x59   : > { %644 = dma.done.wait (%p940_p4), [#allocation6], 512  }
  0x5a   : > { %646 = vsyncadd (%p940_p4), [#allocation6], 4294966784  ;;  %v679_v0 = vmov 0.0   ;;  %vm680_vm0 = vmmov 0   ;;  %v525_v1 = vld [vmem:[#allocation5] sm:$0xff]   ;;  %v526_v2 = vld [vmem:[#allocation5 + $0x8] sm:$0xff]  }
  0x5b   : > { %436 = vmatprep.subr.bf16.mxu0 %v679_v0  ;;  %444 = vmatprep.mubr.msk.bf16.mxu0 %vm680_vm0, %v679_v0  ;;  %v527_v3 = vld [vmem:[#allocation5 + $0x10] sm:$0xff]   ;;  %v528_v4 = vld [vmem:[#allocation5 + $0x18] sm:$0xff]   ;;  %vm259_vm1 = vcmask 523264   ;;  %s420_s20 = sshll.u32 %s851_s19, 3  ;;  %s428_s9 = sshll.u32 %s665_s15, 7 }
  0x5c   : > { %437 = vmatpush3.bf16.msra.mxu0 %v525_v1  ;;  %v219_v5 = vld [vmem:[%s191_s4] sm:$0xf]  ;;  %s217_s10 = scalar_lea.vmem [#allocation7], %s420_s20  ;;  %s871_s6 = scalar_lea.hbm %s923_s3, %s428_s9 }
  0x5d   : > { %438 = vmatprep.subr.bf16.mxu0 %v679_v0  ;;  %v421_v6 = vld [vmem:[%s922_s2] ss:$0 sm:$0xff]  ;;  %s320_s11 = sshll.u32 %s217_s10, 4  ;;  %s306_s26 = scalar_lea.sflag [#allocation4], %s851_s19  ;;  %s873_s11 = int_to_ptr.vmem [resolvable:$true] %s320_s11 }
  0x5e   : > { %s587_s15 = scalar_lea.vmem %s873_s11, 128  ;;  %s681_s7 = smov [#allocation7]  }
  0x5f   : > { %p588_p13 = scmp.ne.s32.totalorder %s873_s11, %s587_s15  ;;  %s591_s8 = sshll.u32 %s681_s7, 4  ;;  %s592_s8 = int_to_ptr.vmem [resolvable:$false] %s591_s8 }
  0x60   : > { %439 = vmatpush3.bf16.msra.mxu0 %v526_v2  ;;  %s593_s21 = scalar_lea.vmem %s592_s8, 256  ;;  %p594_p12 = scmp.lt.s32.totalorder %s873_s11, %s592_s8 }
  0x61   : > { %440 = vmatprep.subr.bf16.mxu0 %v679_v0  ;;  %p589_p6 = pnand %p588_p13, %p798_p10  ;;  %p595_p11 = scmp.lt.s32.totalorder %s593_s21, %s587_s15 }
  0x63   : > { %p590_p8 = pneg %p589_p6  ;;  %p596_p0 = por %p595_p11, %p594_p12 }
  0x64   : > { %441 = vmatpush3.bf16.msra.mxu0 %v527_v3 }
  0x65   : > { %442 = vmatprep.subr.bf16.mxu0 %v679_v0  ;;  %p597_p5 = pnand %p596_p0, %p590_p8 }
  0x68   : > { %443 = vmatpush3.bf16.msra.mxu0 %v528_v4 }
  0x6b   : > { %445 = vmatmul.mubr.msk.bf16.vlgmr.msra.gmra.mrb[0].mxu0 %vm259_vm1, %v219_v5 }
 0x13e   : > { %v297_v7 = vpop.f32.mrb[0].mxu0 }
 0x13f   : > { %v298_v8 = vadd.f32 %v421_v6, %v297_v7  ;;  %v446_v9 = vpop.f32.mrb[1].mxu0 }
 0x140   : > { %v300_v10 = vpop.f32.mrb[2].mxu0 }
 0x141   : > { %v303_v11 = vmax.f32 %v298_v8, 0.0  ;;  %v447_v12 = vpop.f32.mrb[3].mxu0 }
 0x143   : > { %304 = vst [vmem:[%s217_s10] sm:$0xff] %v303_v11 }
 0x144   : > { %600 = shalt.err (!%p597_p5)
}
 0x145   : > { %s601_s19 = scalar_lea.hbm %s871_s6, 128  ;;  %s605_s4 = scalar_lea.hbm %s923_s3, 256 }
 0x146   : > { %p602_p9 = scmp.ne.s32.totalorder %s871_s6, %s601_s19  ;;  %p606_p7 = scmp.lt.u32.totalorder %s871_s6, %s923_s3 }
 0x147   : > { %p607_p3 = scmp.lt.u32.totalorder %s605_s4, %s601_s19  ;;  %p609_p13 = scmp.lt.u32.totalorder %s601_s19, %s871_s6 }
 0x148   : > { %p603_p1 = pnand %p602_p9, %p798_p10 }
 0x149   : > { %p608_p4 = por %p607_p3, %p606_p7 }
 0x14a   : > { %p604_p2 = pneg %p603_p1 }
 0x14b   : > { %p610_p6 = por %p609_p13, %p608_p4 }
 0x14d   : > { %p611_p8 = pnand %p610_p6, %p604_p2 }
 0x14f   : > { %614 = shalt.err (!%p611_p8)
}
 0x150   : > { %454 = dma.vmem_to_hbm [thread:$0]  (%p798_p10), %s873_s11, 128, %s871_s6, %s306_s26  }
 0x151 PF: > { %s332_s24 = sand.u32 1, %s653_s12   ;;  %p941_p12 = scmp.ne.s32.totalorder %s931_s23, 0 }
 0x152   : > { %p942_p11 = scmp.ge.s32.totalorder %s673_s17, 2  ;;  %s333_s9 = scalar_lea.sflag [#allocation4], %s332_s24 }
 0x154   : > { %p465_p0 = pnand %p942_p11, %p941_p12 }
 0x156   : > { %648 = dma.done.wait (!%p465_p0), %s333_s9, 128  }
 0x157   : > { %650 = vsyncadd (!%p465_p0), %s333_s9, 4294967168  ;;  %s20_s17 = sadd.s32 1, %s673_s17   ;;  %s943_s12 = smov %s657_s13 }
 0x158   : > { %p17_p5 = scmp.ge.s32.totalorder %s20_s17, 4   ;;  %s944_s13 = smov %s661_s14 }
 0x159   : > { %s945_s14 = smov %s807_s5  ;;  %s946_s15 = smov %s669_s16 }
 0x15a   : > { %s947_s16 = smov %s949_s28  ;;  %19 = sbr.rel (!%p17_p5) target bundleno = 7 (0x7), region = 81 }
 0x161   :  { %338 = vsyncpa [#allocation3], 1 }
 0x162   :  { %340 = vsyncpa [#allocation3 + $0x1], 1 }
 0x163   :  { %341 = vsyncpa [#allocation6], 1 }
 0x164   :  { %342 = vsyncpa [#allocation4], 1 }
 0x165   :  { %344 = vsyncpa [#allocation4 + $0x1], 1 }

</bundles_post_ra>
